<compile_context>
chip_gen: v6e
topology: v6e:2x2x1
jax: 0.10.0
libtpu: 0.0.40
codegen_flags: <defaults>
</compile_context>

<pallas_src>
import functools

import jax
import jax.numpy as jnp
from jax import lax
from jax.experimental import pallas as pl
from jax.experimental.pallas import tpu as pltpu

BN_EPS = 1e-5    # nn.BatchNorm1d default eps
L2_EPS = 1e-12   # F.normalize default eps


def _kernel(x_ref, wc1_ref, bc1_ref, wc2_ref, bc2_ref,
            w1_ref, b1_ref, gamma_ref, beta_ref, w2_ref, b2_ref,
            logits_ref, feat_ref,
            z_buf, sum_buf, sumsq_buf,
            *, tb, batch):
    i = pl.program_id(0)

    x = x_ref[...]                                            # (TB, Fp) bf16

    # ---------------- fc_cont branch: Linear -> ReLU -> Linear -> L2 norm ----
    h = jnp.dot(x, wc1_ref[...], preferred_element_type=jnp.float32) + bc1_ref[...]
    h = jnp.maximum(h, 0.0)
    feat = jnp.dot(h.astype(jnp.bfloat16), wc2_ref[...],
                   preferred_element_type=jnp.float32) + bc2_ref[...]
    ssq = jnp.sum(feat * feat, axis=1, keepdims=True)
    # x / max(||x||, eps) == x * rsqrt(max(||x||^2, eps^2))  (EUP rsqrt, no div)
    feat_ref[...] = feat * lax.rsqrt(jnp.maximum(ssq, L2_EPS * L2_EPS))

    # ---------------- classifier branch, phase 1: z = x@w1 + b1, BN stats ----
    z = jnp.dot(x, w1_ref[...], preferred_element_type=jnp.float32) + b1_ref[...]
    row0 = pl.multiple_of(i * tb, tb)
    z_buf[pl.ds(row0, tb), :] = z                             # resident z

    # Mask batch-padding rows so they don't pollute the batch statistics.
    row_ids = i * tb + lax.broadcasted_iota(jnp.int32, (tb, 1), 0)
    zm = jnp.where(row_ids < batch, z, 0.0)

    @pl.when(i == 0)
    def _init():
        sum_buf[...] = jnp.zeros_like(sum_buf)
        sumsq_buf[...] = jnp.zeros_like(sumsq_buf)

    # Single fused pass: sum and sum-of-squares together (var = E[z^2] - mean^2).
    sum_buf[...] = sum_buf[...] + jnp.sum(zm, axis=0, keepdims=True)
    sumsq_buf[...] = sumsq_buf[...] + jnp.sum(zm * zm, axis=0, keepdims=True)

    # ---------------- phase 2 (epilogue): BatchNorm + weight-normed fc2 ------
    @pl.when(i == pl.num_programs(0) - 1)
    def _epilogue():
        inv_n = 1.0 / batch
        mean = sum_buf[...] * inv_n
        var = jnp.maximum(sumsq_buf[...] * inv_n - mean * mean, 0.0)
        scale = gamma_ref[...] * lax.rsqrt(var + BN_EPS)
        shift = beta_ref[...] - mean * scale
        zn = (z_buf[...] * scale + shift).astype(jnp.bfloat16)
        logits_ref[...] = (
            jnp.dot(zn, w2_ref[...], preferred_element_type=jnp.float32)
            + b2_ref[...])


def _rup(n, m):
    return pl.cdiv(n, m) * m


def _pad2(a, rows, cols):
    return jnp.pad(a, ((0, rows - a.shape[0]), (0, cols - a.shape[1])))


@functools.partial(jax.jit, static_argnames=("tb",))
def bottleneck_mlp_cont(x, params, tb=256):
    B, F = x.shape
    K = params["w1"].shape[1]       # bottleneck_dim
    C = params["w2"].shape[1]       # num_classes
    L = params["wc2"].shape[1]      # low_dim

    # Lane-dense padding (multiples of 128) and batch tiling.
    Fp, Kp, Cp, Lp = (_rup(d, 128) for d in (F, K, C, L))
    TB = min(tb, _rup(B, 8))
    Bp = _rup(B, TB)
    nb = Bp // TB

    bf = jnp.bfloat16
    xp = _pad2(x, Bp, Fp).astype(bf)
    wc1 = _pad2(params["wc1"], Fp, Fp).astype(bf)
    bc1 = _pad2(params["bc1"], 1, Fp)
    wc2 = _pad2(params["wc2"], Fp, Lp).astype(bf)
    bc2 = _pad2(params["bc2"], 1, Lp)
    w1 = _pad2(params["w1"], Fp, Kp).astype(bf)
    b1 = _pad2(params["b1"], 1, Kp)
    gamma = _pad2(params["gamma"], 1, Kp)
    beta = _pad2(params["beta"], 1, Kp)
    w2 = _pad2(params["w2"], Kp, Cp).astype(bf)
    b2 = _pad2(params["b2"], 1, Cp)

    def resident(shape):
        return pl.BlockSpec(shape, lambda i: (0, 0))

    in_specs = [
        pl.BlockSpec((TB, Fp), lambda i: (i, 0)),   # x: pipelined batch tiles
        resident((Fp, Fp)), resident((1, Fp)),      # wc1, bc1
        resident((Fp, Lp)), resident((1, Lp)),      # wc2, bc2
        resident((Fp, Kp)), resident((1, Kp)),      # w1, b1
        resident((1, Kp)), resident((1, Kp)),       # gamma, beta
        resident((Kp, Cp)), resident((1, Cp)),      # w2, b2
    ]
    out_specs = (
        pl.BlockSpec((Bp, Cp), lambda i: (0, 0)),   # logits: VMEM-resident, epilogue write
        pl.BlockSpec((TB, Lp), lambda i: (i, 0)),   # feat:   pipelined per batch tile
    )

    # Cost hint for XLA scheduling around the custom call.
    flops = 2 * Bp * (Fp * Fp + Fp * Lp + Fp * Kp + Kp * Cp)
    bytes_accessed = (xp.size * 2
                      + (wc1.size + wc2.size + w1.size + w2.size) * 2
                      + Bp * (Cp + Lp) * 4)
    cost = pl.CostEstimate(flops=flops, transcendentals=Bp + Kp,
                           bytes_accessed=bytes_accessed)

    # Explicit VMEM budget derived from tile sizes (double-buffered activations,
    # resident weights, resident z scratch + logits) plus headroom.
    weight_bytes = (wc1.size + wc2.size + w1.size + w2.size) * 2
    bias_bytes = (Fp + Lp + 3 * Kp + Cp) * 4
    vmem_bytes = (2 * TB * Fp * 2          # x double buffer (bf16)
                  + 2 * TB * Lp * 4        # feat out double buffer (f32)
                  + 2 * Bp * Cp * 4        # logits (resident output)
                  + 2 * (weight_bytes + bias_bytes)
                  + Bp * Kp * 4            # resident z scratch
                  + 2 * Kp * 4)            # BN stats scratch
    vmem_limit = min(int(vmem_bytes * 1.5) + (4 << 20), 96 << 20)

    logits, feat = pl.pallas_call(
        functools.partial(_kernel, tb=TB, batch=B),
        out_shape=(jax.ShapeDtypeStruct((Bp, Cp), jnp.float32),
                   jax.ShapeDtypeStruct((Bp, Lp), jnp.float32)),
        grid_spec=pltpu.PrefetchScalarGridSpec(
            num_scalar_prefetch=0,
            grid=(nb,),
            in_specs=in_specs,
            out_specs=out_specs,
            scratch_shapes=[pltpu.VMEM((Bp, Kp), jnp.float32),   # resident z
                            pltpu.VMEM((1, Kp), jnp.float32),    # sum(z)
                            pltpu.VMEM((1, Kp), jnp.float32)]),  # sum(z*z)
        compiler_params=pltpu.CompilerParams(
            # The single grid axis carries the BatchNorm batch reduction
            # (resident logits + stats accumulation) -> must stay sequential.
            dimension_semantics=("arbitrary",),
            vmem_limit_bytes=vmem_limit),
        cost_estimate=cost,
    )(xp, wc1, bc1, wc2, bc2, w1, b1, gamma, beta, w2, b2)

    return logits[:B, :C], feat[:B, :L]


def init_params(key, feature_dim, bottleneck_dim, num_classes, low_dim):
    """Deterministic, shape-faithful synthetic init (xavier-normal weights, zero biases)."""
    ks = jax.random.split(key, 4)

    def xavier(k, fan_in, fan_out):
        std = (2.0 / (fan_in + fan_out)) ** 0.5
        return std * jax.random.normal(k, (fan_in, fan_out), jnp.float32)

    wc1 = xavier(ks[0], feature_dim, feature_dim)        # fc_cont[0]
    wc2 = xavier(ks[1], feature_dim, low_dim)            # fc_cont[2]
    w1 = xavier(ks[2], feature_dim, bottleneck_dim)      # fc1

    # fc2 with weight_norm: weight = g * v / ||v|| (per output unit). At init
    # g = ||v||, so the effective weight equals v; computed here as glue.
    v = xavier(ks[3], bottleneck_dim, num_classes)
    v_norm = jnp.sqrt(jnp.sum(v * v, axis=0, keepdims=True))
    w2 = v_norm * v / v_norm

    return dict(
        wc1=wc1, bc1=jnp.zeros((1, feature_dim), jnp.float32),
        wc2=wc2, bc2=jnp.zeros((1, low_dim), jnp.float32),
        w1=w1, b1=jnp.zeros((1, bottleneck_dim), jnp.float32),
        gamma=jnp.ones((1, bottleneck_dim), jnp.float32),   # BN affine weight
        beta=jnp.zeros((1, bottleneck_dim), jnp.float32),   # BN affine bias
        w2=w2, b2=jnp.zeros((1, num_classes), jnp.float32),
    )


def reference(x, p):
    """Pure-JAX reference of the same forward pass, mirroring the kernel's
    bf16-operand / f32-accumulation matmul precision (PyTorch f32 would differ
    only by bf16-class rounding)."""
    bf = jnp.bfloat16
    xb = x.astype(bf)

    h = jnp.dot(xb, p["wc1"].astype(bf), preferred_element_type=jnp.float32) + p["bc1"]
    h = jnp.maximum(h, 0.0)
    feat = jnp.dot(h.astype(bf), p["wc2"].astype(bf),
                   preferred_element_type=jnp.float32) + p["bc2"]
    ssq = jnp.sum(feat * feat, axis=1, keepdims=True)
    feat_n = feat * lax.rsqrt(jnp.maximum(ssq, L2_EPS * L2_EPS))

    z = jnp.dot(xb, p["w1"].astype(bf), preferred_element_type=jnp.float32) + p["b1"]
    mean = jnp.mean(z, axis=0, keepdims=True)
    var = jnp.maximum(jnp.mean(z * z, axis=0, keepdims=True) - mean * mean, 0.0)
    scale = p["gamma"] * lax.rsqrt(var + BN_EPS)
    shift = p["beta"] - mean * scale
    zn = (z * scale + shift).astype(bf)
    logits = jnp.dot(zn, p["w2"].astype(bf), preferred_element_type=jnp.float32) + p["b2"]
    return logits, feat_n


if __name__ == "__main__":
    # Small shapes consistent with the module's forward: x is [B, feature_dim].
    # Deliberately non-multiples of 128 / 8 so padding, masking and the multi-
    # tile BN accumulation path are all exercised (tb=8 -> 3 batch tiles).
    B, feature_dim, bottleneck_dim, num_classes, low_dim = 20, 96, 48, 12, 24

    key = jax.random.PRNGKey(0)
    kx, kp = jax.random.split(key)
    x = jax.random.normal(kx, (B, feature_dim), jnp.float32)
    params = init_params(kp, feature_dim, bottleneck_dim, num_classes, low_dim)

    logits, feat_norm = bottleneck_mlp_cont(x, params, tb=8)
    jax.block_until_ready((logits, feat_norm))

    ref_logits, ref_feat = reference(x, params)
    assert logits.shape == (B, num_classes)
    assert feat_norm.shape == (B, low_dim)
    assert jnp.allclose(logits, ref_logits, atol=1e-2, rtol=1e-2), \
        float(jnp.max(jnp.abs(logits - ref_logits)))
    assert jnp.allclose(feat_norm, ref_feat, atol=1e-2, rtol=1e-2), \
        float(jnp.max(jnp.abs(feat_norm - ref_feat)))

    print("KERNEL_OK")
</pallas_src>

<mosaic_0001>
module attributes {stable_mosaic.version = 11 : i64} {
  func.func @_kernel(%arg0: i32, %arg1: memref<8x128xbf16, #tpu.memory_space<vmem>>, %arg2: memref<128x128xbf16, #tpu.memory_space<vmem>>, %arg3: memref<1x128xf32, #tpu.memory_space<vmem>>, %arg4: memref<128x128xbf16, #tpu.memory_space<vmem>>, %arg5: memref<1x128xf32, #tpu.memory_space<vmem>>, %arg6: memref<128x128xbf16, #tpu.memory_space<vmem>>, %arg7: memref<1x128xf32, #tpu.memory_space<vmem>>, %arg8: memref<1x128xf32, #tpu.memory_space<vmem>>, %arg9: memref<1x128xf32, #tpu.memory_space<vmem>>, %arg10: memref<128x128xbf16, #tpu.memory_space<vmem>>, %arg11: memref<1x128xf32, #tpu.memory_space<vmem>>, %arg12: memref<24x128xf32, #tpu.memory_space<vmem>>, %arg13: memref<8x128xf32, #tpu.memory_space<vmem>>, %arg14: memref<24x128xf32, #tpu.memory_space<vmem>>, %arg15: memref<1x128xf32, #tpu.memory_space<vmem>>, %arg16: memref<1x128xf32, #tpu.memory_space<vmem>>) attributes {dimension_semantics = [#tpu.dimension_semantics<arbitrary>], iteration_bounds = array<i64: 3>, scalar_prefetch = 0 : i64, scratch_operands = 3 : i64, tpu.core_type = #tpu.core_type<tc>, window_params = [{transform_indices = @transform_0, window_bounds = array<i64: 8, 128>}, {pipeline_mode = #tpu.pipeline_mode<synchronous>, transform_indices = @transform_1, window_bounds = array<i64: 128, 128>}, {pipeline_mode = #tpu.pipeline_mode<synchronous>, transform_indices = @transform_2, window_bounds = array<i64: 1, 128>}, {pipeline_mode = #tpu.pipeline_mode<synchronous>, transform_indices = @transform_3, window_bounds = array<i64: 128, 128>}, {pipeline_mode = #tpu.pipeline_mode<synchronous>, transform_indices = @transform_4, window_bounds = array<i64: 1, 128>}, {pipeline_mode = #tpu.pipeline_mode<synchronous>, transform_indices = @transform_5, window_bounds = array<i64: 128, 128>}, {pipeline_mode = #tpu.pipeline_mode<synchronous>, transform_indices = @transform_6, window_bounds = array<i64: 1, 128>}, {pipeline_mode = #tpu.pipeline_mode<synchronous>, transform_indices = @transform_7, window_bounds = array<i64: 1, 128>}, {pipeline_mode = #tpu.pipeline_mode<synchronous>, transform_indices = @transform_8, window_bounds = array<i64: 1, 128>}, {pipeline_mode = #tpu.pipeline_mode<synchronous>, transform_indices = @transform_9, window_bounds = array<i64: 128, 128>}, {pipeline_mode = #tpu.pipeline_mode<synchronous>, transform_indices = @transform_10, window_bounds = array<i64: 1, 128>}, {pipeline_mode = #tpu.pipeline_mode<synchronous>, transform_indices = @transform_11, window_bounds = array<i64: 24, 128>}, {transform_indices = @transform_12, window_bounds = array<i64: 8, 128>}]} {
    %c0 = arith.constant 0 : index
    %c0_0 = arith.constant 0 : index
    %0 = vector.load %arg1[%c0, %c0_0] : memref<8x128xbf16, #tpu.memory_space<vmem>>, vector<8x128xbf16>
    %c0_1 = arith.constant 0 : index
    %c0_2 = arith.constant 0 : index
    %1 = vector.load %arg2[%c0_1, %c0_2] : memref<128x128xbf16, #tpu.memory_space<vmem>>, vector<128x128xbf16>
    %cst = arith.constant dense<0.000000e+00> : vector<8x128xf32>
    %2 = tpu.matmul %0, %1, %cst {dimension_numbers = #tpu.dot_dimension_numbers<[1], [0], [0], [1], [0, 0, 1, 1], [], []>} : vector<8x128xbf16>, vector<128x128xbf16>, vector<8x128xf32> -> vector<8x128xf32>
    %c0_3 = arith.constant 0 : index
    %c0_4 = arith.constant 0 : index
    %3 = vector.load %arg3[%c0_3, %c0_4] : memref<1x128xf32, #tpu.memory_space<vmem>>, vector<1x128xf32>
    %4 = vector.broadcast %3 : vector<1x128xf32> to vector<8x128xf32>
    %5 = arith.addf %2, %4 : vector<8x128xf32>
    %cst_5 = arith.constant 0.000000e+00 : f32
    %6 = vector.broadcast %cst_5 : f32 to vector<8x128xf32>
    %7 = arith.maximumf %5, %6 : vector<8x128xf32>
    %8 = arith.truncf %7 : vector<8x128xf32> to vector<8x128xbf16>
    %c0_6 = arith.constant 0 : index
    %c0_7 = arith.constant 0 : index
    %9 = vector.load %arg4[%c0_6, %c0_7] : memref<128x128xbf16, #tpu.memory_space<vmem>>, vector<128x128xbf16>
    %cst_8 = arith.constant dense<0.000000e+00> : vector<8x128xf32>
    %10 = tpu.matmul %8, %9, %cst_8 {dimension_numbers = #tpu.dot_dimension_numbers<[1], [0], [0], [1], [0, 0, 1, 1], [], []>} : vector<8x128xbf16>, vector<128x128xbf16>, vector<8x128xf32> -> vector<8x128xf32>
    %c0_9 = arith.constant 0 : index
    %c0_10 = arith.constant 0 : index
    %11 = vector.load %arg5[%c0_9, %c0_10] : memref<1x128xf32, #tpu.memory_space<vmem>>, vector<1x128xf32>
    %12 = vector.broadcast %11 : vector<1x128xf32> to vector<8x128xf32>
    %13 = arith.addf %10, %12 : vector<8x128xf32>
    %14 = arith.mulf %13, %13 : vector<8x128xf32>
    %cst_11 = arith.constant dense<0.000000e+00> : vector<8xf32>
    %15 = vector.multi_reduction <add>, %14, %cst_11 [1] : vector<8x128xf32> to vector<8xf32>
    %16 = vector.shape_cast %15 : vector<8xf32> to vector<8x1xf32>
    %cst_12 = arith.constant 1.000000e-24 : f32
    %17 = vector.broadcast %cst_12 : f32 to vector<8x1xf32>
    %18 = arith.maximumf %16, %17 : vector<8x1xf32>
    %19 = math.rsqrt %18 : vector<8x1xf32>
    %20 = vector.broadcast %19 : vector<8x1xf32> to vector<8x128xf32>
    %21 = arith.mulf %13, %20 : vector<8x128xf32>
    %c0_13 = arith.constant 0 : index
    %c0_14 = arith.constant 0 : index
    %22 = vector.load %arg13[%c0_13, %c0_14] : memref<8x128xf32, #tpu.memory_space<vmem>>, vector<8x128xf32>
    tpu.vector_store %arg13[%c0_13, %c0_14], %21 {strides = array<i32>} : memref<8x128xf32, #tpu.memory_space<vmem>>, vector<8x128xf32>,
    %c0_15 = arith.constant 0 : index
    %c0_16 = arith.constant 0 : index
    %23 = vector.load %arg6[%c0_15, %c0_16] : memref<128x128xbf16, #tpu.memory_space<vmem>>, vector<128x128xbf16>
    %cst_17 = arith.constant dense<0.000000e+00> : vector<8x128xf32>
    %24 = tpu.matmul %0, %23, %cst_17 {dimension_numbers = #tpu.dot_dimension_numbers<[1], [0], [0], [1], [0, 0, 1, 1], [], []>} : vector<8x128xbf16>, vector<128x128xbf16>, vector<8x128xf32> -> vector<8x128xf32>
    %c0_18 = arith.constant 0 : index
    %c0_19 = arith.constant 0 : index
    %25 = vector.load %arg7[%c0_18, %c0_19] : memref<1x128xf32, #tpu.memory_space<vmem>>, vector<1x128xf32>
    %26 = vector.broadcast %25 : vector<1x128xf32> to vector<8x128xf32>
    %27 = arith.addf %24, %26 : vector<8x128xf32>
    %c8_i32 = arith.constant 8 : i32
    %28 = arith.muli %arg0, %c8_i32 : i32
    %29 = tpu.assume_multiple %28, 8 : i32
    %30 = arith.index_cast %29 : i32 to index
    %c0_20 = arith.constant 0 : index
    %31 = vector.load %arg14[%30, %c0_20] : memref<24x128xf32, #tpu.memory_space<vmem>>, vector<8x128xf32>
    tpu.vector_store %arg14[%30, %c0_20], %27 {strides = array<i32>} : memref<24x128xf32, #tpu.memory_space<vmem>>, vector<8x128xf32>,
    %c8_i32_21 = arith.constant 8 : i32
    %32 = arith.muli %arg0, %c8_i32_21 : i32
    %33 = tpu.iota {dimensions = array<i32: 0>} : vector<8x1xi32>
    %34 = vector.broadcast %32 : i32 to vector<8x1xi32>
    %35 = arith.addi %34, %33 : vector<8x1xi32>
    %c20_i32 = arith.constant 20 : i32
    %36 = vector.broadcast %c20_i32 : i32 to vector<8x1xi32>
    %37 = arith.cmpi slt, %35, %36 : vector<8x1xi32>
    %cst_22 = arith.constant 0.000000e+00 : f32
    %38 = vector.shape_cast %37 : vector<8x1xi1> to vector<8x1xi1>
    %39 = vector.broadcast %38 : vector<8x1xi1> to vector<8x128xi1>
    %40 = vector.broadcast %cst_22 : f32 to vector<8x128xf32>
    %41 = arith.select %39, %27, %40 : vector<8x128xi1>, vector<8x128xf32>
    %c0_i32 = arith.constant 0 : i32
    %42 = arith.cmpi eq, %arg0, %c0_i32 : i32
    %43 = arith.extui %42 : i1 to i32
    %c0_i32_23 = arith.constant 0 : i32
    %44 = arith.cmpi ne, %43, %c0_i32_23 : i32
    scf.if %44 {
      %cst_35 = arith.constant 0.000000e+00 : f32
      %59 = vector.broadcast %cst_35 : f32 to vector<1x128xf32>
      %c0_36 = arith.constant 0 : index
      %c0_37 = arith.constant 0 : index
      %60 = vector.load %arg15[%c0_36, %c0_37] : memref<1x128xf32, #tpu.memory_space<vmem>>, vector<1x128xf32>
      tpu.vector_store %arg15[%c0_36, %c0_37], %59 {strides = array<i32>} : memref<1x128xf32, #tpu.memory_space<vmem>>, vector<1x128xf32>,
      %cst_38 = arith.constant 0.000000e+00 : f32
      %61 = vector.broadcast %cst_38 : f32 to vector<1x128xf32>
      %c0_39 = arith.constant 0 : index
      %c0_40 = arith.constant 0 : index
      %62 = vector.load %arg16[%c0_39, %c0_40] : memref<1x128xf32, #tpu.memory_space<vmem>>, vector<1x128xf32>
      tpu.vector_store %arg16[%c0_39, %c0_40], %61 {strides = array<i32>} : memref<1x128xf32, #tpu.memory_space<vmem>>, vector<1x128xf32>,
    } else {
    }
    %c0_24 = arith.constant 0 : index
    %c0_25 = arith.constant 0 : index
    %45 = vector.load %arg15[%c0_24, %c0_25] : memref<1x128xf32, #tpu.memory_space<vmem>>, vector<1x128xf32>
    %cst_26 = arith.constant dense<0.000000e+00> : vector<128xf32>
    %46 = vector.multi_reduction <add>, %41, %cst_26 [0] : vector<8x128xf32> to vector<128xf32>
    %47 = vector.shape_cast %46 : vector<128xf32> to vector<1x128xf32>
    %48 = arith.addf %45, %47 : vector<1x128xf32>
    %c0_27 = arith.constant 0 : index
    %c0_28 = arith.constant 0 : index
    %49 = vector.load %arg15[%c0_27, %c0_28] : memref<1x128xf32, #tpu.memory_space<vmem>>, vector<1x128xf32>
    tpu.vector_store %arg15[%c0_27, %c0_28], %48 {strides = array<i32>} : memref<1x128xf32, #tpu.memory_space<vmem>>, vector<1x128xf32>,
    %c0_29 = arith.constant 0 : index
    %c0_30 = arith.constant 0 : index
    %50 = vector.load %arg16[%c0_29, %c0_30] : memref<1x128xf32, #tpu.memory_space<vmem>>, vector<1x128xf32>
    %51 = arith.mulf %41, %41 : vector<8x128xf32>
    %cst_31 = arith.constant dense<0.000000e+00> : vector<128xf32>
    %52 = vector.multi_reduction <add>, %51, %cst_31 [0] : vector<8x128xf32> to vector<128xf32>
    %53 = vector.shape_cast %52 : vector<128xf32> to vector<1x128xf32>
    %54 = arith.addf %50, %53 : vector<1x128xf32>
    %c0_32 = arith.constant 0 : index
    %c0_33 = arith.constant 0 : index
    %55 = vector.load %arg16[%c0_32, %c0_33] : memref<1x128xf32, #tpu.memory_space<vmem>>, vector<1x128xf32>
    tpu.vector_store %arg16[%c0_32, %c0_33], %54 {strides = array<i32>} : memref<1x128xf32, #tpu.memory_space<vmem>>, vector<1x128xf32>,
    %c2_i32 = arith.constant 2 : i32
    %56 = arith.cmpi eq, %arg0, %c2_i32 : i32
    %57 = arith.extui %56 : i1 to i32
    %c0_i32_34 = arith.constant 0 : i32
    %58 = arith.cmpi ne, %57, %c0_i32_34 : i32
    scf.if %58 {
      %c0_35 = arith.constant 0 : index
      %c0_36 = arith.constant 0 : index
      %59 = vector.load %arg15[%c0_35, %c0_36] : memref<1x128xf32, #tpu.memory_space<vmem>>, vector<1x128xf32>
      %cst_37 = arith.constant 5.000000e-02 : f32
      %60 = vector.broadcast %cst_37 : f32 to vector<1x128xf32>
      %61 = arith.mulf %59, %60 : vector<1x128xf32>
      %c0_38 = arith.constant 0 : index
      %c0_39 = arith.constant 0 : index
      %62 = vector.load %arg16[%c0_38, %c0_39] : memref<1x128xf32, #tpu.memory_space<vmem>>, vector<1x128xf32>
      %cst_40 = arith.constant 5.000000e-02 : f32
      %63 = vector.broadcast %cst_40 : f32 to vector<1x128xf32>
      %64 = arith.mulf %62, %63 : vector<1x128xf32>
      %65 = arith.mulf %61, %61 : vector<1x128xf32>
      %66 = arith.subf %64, %65 : vector<1x128xf32>
      %cst_41 = arith.constant 0.000000e+00 : f32
      %67 = vector.broadcast %cst_41 : f32 to vector<1x128xf32>
      %68 = arith.maximumf %66, %67 : vector<1x128xf32>
      %c0_42 = arith.constant 0 : index
      %c0_43 = arith.constant 0 : index
      %69 = vector.load %arg8[%c0_42, %c0_43] : memref<1x128xf32, #tpu.memory_space<vmem>>, vector<1x128xf32>
      %cst_44 = arith.constant 9.99999974E-6 : f32
      %70 = vector.broadcast %cst_44 : f32 to vector<1x128xf32>
      %71 = arith.addf %68, %70 : vector<1x128xf32>
      %72 = math.rsqrt %71 : vector<1x128xf32>
      %73 = arith.mulf %69, %72 : vector<1x128xf32>
      %c0_45 = arith.constant 0 : index
      %c0_46 = arith.constant 0 : index
      %74 = vector.load %arg9[%c0_45, %c0_46] : memref<1x128xf32, #tpu.memory_space<vmem>>, vector<1x128xf32>
      %75 = arith.mulf %61, %73 : vector<1x128xf32>
      %76 = arith.subf %74, %75 : vector<1x128xf32>
      %c0_47 = arith.constant 0 : index
      %c0_48 = arith.constant 0 : index
      %77 = vector.load %arg14[%c0_47, %c0_48] : memref<24x128xf32, #tpu.memory_space<vmem>>, vector<24x128xf32>
      %78 = vector.broadcast %73 : vector<1x128xf32> to vector<24x128xf32>
      %79 = arith.mulf %77, %78 : vector<24x128xf32>
      %80 = vector.broadcast %76 : vector<1x128xf32> to vector<24x128xf32>
      %81 = arith.addf %79, %80 : vector<24x128xf32>
      %82 = arith.truncf %81 : vector<24x128xf32> to vector<24x128xbf16>
      %c0_49 = arith.constant 0 : index
      %c0_50 = arith.constant 0 : index
      %83 = vector.load %arg10[%c0_49, %c0_50] : memref<128x128xbf16, #tpu.memory_space<vmem>>, vector<128x128xbf16>
      %cst_51 = arith.constant dense<0.000000e+00> : vector<24x128xf32>
      %84 = tpu.matmul %82, %83, %cst_51 {dimension_numbers = #tpu.dot_dimension_numbers<[1], [0], [0], [1], [0, 0, 1, 1], [], []>} : vector<24x128xbf16>, vector<128x128xbf16>, vector<24x128xf32> -> vector<24x128xf32>
      %c0_52 = arith.constant 0 : index
      %c0_53 = arith.constant 0 : index
      %85 = vector.load %arg11[%c0_52, %c0_53] : memref<1x128xf32, #tpu.memory_space<vmem>>, vector<1x128xf32>
      %86 = vector.broadcast %85 : vector<1x128xf32> to vector<24x128xf32>
      %87 = arith.addf %84, %86 : vector<24x128xf32>
      %c0_54 = arith.constant 0 : index
      %c0_55 = arith.constant 0 : index
      %88 = vector.load %arg12[%c0_54, %c0_55] : memref<24x128xf32, #tpu.memory_space<vmem>>, vector<24x128xf32>
      tpu.vector_store %arg12[%c0_54, %c0_55], %87 {strides = array<i32>} : memref<24x128xf32, #tpu.memory_space<vmem>>, vector<24x128xf32>,
    } else {
    }
    return
  }
  func.func @transform_0(%arg0: i32) -> (i32, i32) {
    %c0_i32 = arith.constant 0 : i32
    %c0_i32_0 = arith.constant 0 : i32
    return %arg0, %c0_i32 : i32, i32
  }
  func.func @transform_1(%arg0: i32) -> (i32, i32) {
    %c0_i32 = arith.constant 0 : i32
    %c0_i32_0 = arith.constant 0 : i32
    %c0_i32_1 = arith.constant 0 : i32
    return %c0_i32, %c0_i32_0 : i32, i32
  }
  func.func @transform_2(%arg0: i32) -> (i32, i32) {
    %c0_i32 = arith.constant 0 : i32
    %c0_i32_0 = arith.constant 0 : i32
    %c0_i32_1 = arith.constant 0 : i32
    return %c0_i32, %c0_i32_0 : i32, i32
  }
  func.func @transform_3(%arg0: i32) -> (i32, i32) {
    %c0_i32 = arith.constant 0 : i32
    %c0_i32_0 = arith.constant 0 : i32
    %c0_i32_1 = arith.constant 0 : i32
    return %c0_i32, %c0_i32_0 : i32, i32
  }
  func.func @transform_4(%arg0: i32) -> (i32, i32) {
    %c0_i32 = arith.constant 0 : i32
    %c0_i32_0 = arith.constant 0 : i32
    %c0_i32_1 = arith.constant 0 : i32
    return %c0_i32, %c0_i32_0 : i32, i32
  }
  func.func @transform_5(%arg0: i32) -> (i32, i32) {
    %c0_i32 = arith.constant 0 : i32
    %c0_i32_0 = arith.constant 0 : i32
    %c0_i32_1 = arith.constant 0 : i32
    return %c0_i32, %c0_i32_0 : i32, i32
  }
  func.func @transform_6(%arg0: i32) -> (i32, i32) {
    %c0_i32 = arith.constant 0 : i32
    %c0_i32_0 = arith.constant 0 : i32
    %c0_i32_1 = arith.constant 0 : i32
    return %c0_i32, %c0_i32_0 : i32, i32
  }
  func.func @transform_7(%arg0: i32) -> (i32, i32) {
    %c0_i32 = arith.constant 0 : i32
    %c0_i32_0 = arith.constant 0 : i32
    %c0_i32_1 = arith.constant 0 : i32
    return %c0_i32, %c0_i32_0 : i32, i32
  }
  func.func @transform_8(%arg0: i32) -> (i32, i32) {
    %c0_i32 = arith.constant 0 : i32
    %c0_i32_0 = arith.constant 0 : i32
    %c0_i32_1 = arith.constant 0 : i32
    return %c0_i32, %c0_i32_0 : i32, i32
  }
  func.func @transform_9(%arg0: i32) -> (i32, i32) {
    %c0_i32 = arith.constant 0 : i32
    %c0_i32_0 = arith.constant 0 : i32
    %c0_i32_1 = arith.constant 0 : i32
    return %c0_i32, %c0_i32_0 : i32, i32
  }
  func.func @transform_10(%arg0: i32) -> (i32, i32) {
    %c0_i32 = arith.constant 0 : i32
    %c0_i32_0 = arith.constant 0 : i32
    %c0_i32_1 = arith.constant 0 : i32
    return %c0_i32, %c0_i32_0 : i32, i32
  }
  func.func @transform_11(%arg0: i32) -> (i32, i32) {
    %c0_i32 = arith.constant 0 : i32
    %c0_i32_0 = arith.constant 0 : i32
    %c0_i32_1 = arith.constant 0 : i32
    return %c0_i32, %c0_i32_0 : i32, i32
  }
  func.func @transform_12(%arg0: i32) -> (i32, i32) {
    %c0_i32 = arith.constant 0 : i32
    %c0_i32_0 = arith.constant 0 : i32
    return %arg0, %c0_i32 : i32, i32
  }
}

</mosaic_0001>

<bundles_post_ra>
// kernel: bottleneck_mlp_cont.1
= control target key start
LH: loop header
LB: loop body
LE: loop exit
PB: predicated region body
PF: predicated region fallthrough
CT: control target
= control target key end

     0   :  { %s1664_s0 = inlined_call_operand.vmem [shape: bf16[24,128], index: 0, kind: input, shape index: {}]   ;;  %s1665_s1 = inlined_call_operand.vmem [shape: bf16[128,128], index: 1, kind: input, shape index: {}]   ;;  %s1666_s2 = inlined_call_operand.vmem [shape: f32[1,128], index: 2, kind: input, shape index: {}]   ;;  %s1667_s3 = inlined_call_operand.vmem [shape: bf16[128,128], index: 3, kind: input, shape index: {}]   ;;  %s1668_s4 = inlined_call_operand.vmem [shape: f32[1,128], index: 4, kind: input, shape index: {}]   ;;  %s1669_s5 = inlined_call_operand.vmem [shape: bf16[128,128], index: 5, kind: input, shape index: {}]   ;;  %s1670_s6 = inlined_call_operand.vmem [shape: f32[1,128], index: 6, kind: input, shape index: {}]   ;;  %s1671_s7 = inlined_call_operand.vmem [shape: f32[1,128], index: 7, kind: input, shape index: {}]   ;;  %s1672_s8 = inlined_call_operand.vmem [shape: f32[1,128], index: 8, kind: input, shape index: {}]   ;;  %s1673_s9 = inlined_call_operand.vmem [shape: bf16[128,128], index: 9, kind: input, shape index: {}]   ;;  %s1674_s10 = inlined_call_operand.vmem [shape: f32[1,128], index: 10, kind: input, shape index: {}]   ;;  %s1675_s11 = inlined_call_operand.vmem [shape: f32[24,128], index: 11, kind: output, shape index: {0}]   ;;  %s1676_s12 = inlined_call_operand.hbm [shape: f32[24,128], index: 12, kind: output, shape index: {1}]  }
   0x1   :  { %1679 = sst [smem:[#allocation10_spill]] %s1664_s0 }
   0x2   :  { %1680 = sst [smem:[#allocation11_spill]] %s1665_s1 }
   0x3   :  { %18 = vsyncpa [#allocation6], 0 }
   0x4   :  { %20 = vsyncpa [#allocation6 + $0x1], 0  ;;  %s1406_s21 = smov 0   ;;  %s1408_s22 = smov 0  }
   0x5   :  { %s1410_s23 = smov 0   ;;  %s1412_s24 = smov 0  }
   0x6 LB: > { %1681 = sst [smem:[#allocation8_spill]] %s1331_s23  ;;  %s1427_s25 = sadd.s32 4294967295, %s1335_s24   ;;  %s1335_s24 = sphi %s1412_s24, %s1692_s24   ;;  %s1331_s23 = sphi %s1410_s23, %s1689_s23   ;;  %s1327_s22 = sphi %s1408_s22, %s1691_s22   ;;  %s1323_s21 = sphi %s1406_s21, %s1690_s21  }
   0x7   : > { %s1031_s26 = sadd.s32 4294967294, %s1335_s24   ;;  %s1431_s27 = sadd.s32 1, %s1335_s24  }
   0x8   : > { %s290_s28 = sadd.s32 1, %s1331_s23  ;;  %s287_s29 = ssub.s32 %s1335_s24, %s1431_s27 }
   0x9   : > { %p300_p0 = scmp.ne.s32.totalorder %s1331_s23, %s1327_s22  ;;  %p288_p1 = scmp.eq.s32.totalorder %s287_s29, 0 }
   0xa   : > { %p301_p2 = scmp.eq.s32.totalorder %s1427_s25, 2  ;;  %p306_p3 = scmp.ne.s32.totalorder %s1327_s22, %s1323_s21 }
   0xb   : > { %p307_p4 = scmp.eq.s32.totalorder %s1031_s26, 2  ;;  %p1034_p7 = scmp.ge.s32.totalorder %s1335_s24, 1 }
   0xc   : > { %s1442_s30 = scalar_select %p288_p1, %s1331_s23, %s290_s28  }
   0xd   : > { %p1444_p5 = por %p301_p2, %p300_p0  ;;  %p1448_p6 = por %p307_p4, %p306_p3 }
   0xe   : > { %1682 = sst [smem:[#allocation9_spill]] %s1442_s30  ;;  %p362_p8 = scmp.lt.s32.totalorder %s1335_s24, 4 }
  0x10   : > { %p363_p9 = pnand %p1034_p7, %p362_p8 }
  0x11   : > { %s1685_s1 = sld [smem:[#allocation11_spill]] (!%p363_p9)  ;;  %p403_p10 = scmp.lt.s32.totalorder (!%p363_p9), %s1427_s25, 2 }
  0x12   : > { %366 = sbr.rel (%p363_p9) target bundleno = 896 (0x380), region = 64  ;;  %s1686_s0 = sld [smem:[#allocation10_spill]] (!%p363_p9) }
  0x13   : > { %s1064_s23 = sshll.u32 (!%p363_p9), %s1427_s25, 3  ;;  %s1678_s15 = sand.u32 (!%p363_p9), 1, %s1327_s22  }
  0x14   : > { %s1577_s16 = sshll.u32 (!%p363_p9), %s1678_s15, 3  ;;  %p1065_p11 = scmp.ne.s32.totalorder (!%p363_p9), %s1427_s25, 0 }
  0x15   : > { %s402_s17 = scalar_lea.vmem (!%p363_p9), [#allocation5], %s1577_s16 }
  0x17   : > { %v1239_v0 = vld [vmem:[%s1685_s1 + $0x38] sm:$0xff]   ;;  %v1337_v1 = vmov 0.0   ;;  %v1240_v2 = vld [vmem:[%s1685_s1 + $0x30] sm:$0xff]   ;;  %vm1338_vm0 = vmmov 0   ;;  %v1241_v3 = vld [vmem:[%s1685_s1 + $0x28] sm:$0xff]   ;;  %s404_s20 = scalar_select %p403_p10, %s1427_s25, 2  ;;  %v754_v42 = vlaneseq  ;;  %v756_v46 = vstv %s1064_s23 }
  0x18   : > { %1117 = vmatprep.subr.bf16.mxu0 %v1337_v1  ;;  %1137 = vmatprep.subr.bf16.mxu1 %v1337_v1  ;;  %v1247_v4 = vld [vmem:[%s1667_s3 + $0x38] sm:$0xff]   ;;  %v1242_v5 = vld [vmem:[%s1685_s1 + $0x20] sm:$0xff]   ;;  %v1248_v6 = vld [vmem:[%s1667_s3 + $0x30] sm:$0xff]  }
  0x19   : > { %1118 = vmatpush3.bf16.msra.mxu0 %v1239_v0  ;;  %1133 = vmatprep.mubr.msk.bf16.mxu0 %vm1338_vm0, %v1337_v1  ;;  %v1243_v7 = vld [vmem:[%s1685_s1 + $0x18] sm:$0xff]   ;;  %v1249_v8 = vld [vmem:[%s1667_s3 + $0x28] sm:$0xff]   ;;  %v1244_v9 = vld [vmem:[%s1685_s1 + $0x10] sm:$0xff]   ;;  %s1036_s29 = sshll.u32 %s404_s20, 2  ;;  %v1568_v44 = vshrl.u32 %v754_v42, 7 }
  0x1a   : > { %1119 = vmatprep.subr.bf16.mxu0 %v1337_v1  ;;  %1153 = vmatprep.mubr.msk.bf16.mxu1 %vm1338_vm0, %v1337_v1  ;;  %v1250_v10 = vld [vmem:[%s1667_s3 + $0x20] sm:$0xff]   ;;  %v1245_v11 = vld [vmem:[%s1685_s1 + $0x8] sm:$0xff]   ;;  %v1251_v12 = vld [vmem:[%s1667_s3 + $0x18] sm:$0xff]   ;;  %s406_s19 = scalar_lea.vmem %s1686_s0, %s1036_s29  ;;  %s752_s29 = scalar_lea.vmem [#allocation2], %s1064_s23 }
  0x1b   : > { %1138 = vmatpush3.bf16.msra.mxu1 %v1247_v4  ;;  %v1246_v13 = vld [vmem:[%s1685_s1] sm:$0xff]   ;;  %v1252_v14 = vld [vmem:[%s1667_s3 + $0x10] sm:$0xff]   ;;  %v1253_v16 = vld [vmem:[%s1667_s3 + $0x8] sm:$0xff]   ;;  %v757_v48 = vadd.s32 %v756_v46, %v1568_v44 }
  0x1c   : > { %1139 = vmatprep.subr.bf16.mxu1 %v1337_v1  ;;  %v408_v15 = vld [vmem:[%s406_s19] sm:$0xf]  ;;  %v1255_v18 = vld [vmem:[%s1669_s5 + $0x38] sm:$0xff]   ;;  %v1256_v19 = vld [vmem:[%s1669_s5 + $0x30] sm:$0xff]  }
  0x1d   : > { %1120 = vmatpush3.bf16.msra.mxu0 %v1240_v2  ;;  %v1254_v17 = vld [vmem:[%s1667_s3] sm:$0xff]   ;;  %v1257_v20 = vld [vmem:[%s1669_s5 + $0x28] sm:$0xff]   ;;  %v1259_v22 = vld [vmem:[%s1669_s5 + $0x18] sm:$0xff]   ;;  %vm758_vm1 = vcmp.lt.s32.totalorder %v757_v48, 20 }
  0x1e   : > { %1121 = vmatprep.subr.bf16.mxu0 %v1337_v1  ;;  %v1258_v21 = vld [vmem:[%s1669_s5 + $0x20] sm:$0xff]   ;;  %v1260_v23 = vld [vmem:[%s1669_s5 + $0x10] sm:$0xff]   ;;  %v1261_v24 = vld [vmem:[%s1669_s5 + $0x8] sm:$0xff]  }
  0x1f   : > { %1140 = vmatpush3.bf16.msra.mxu1 %v1248_v6  ;;  %v1262_v25 = vld [vmem:[%s1669_s5] sm:$0xff]  }
  0x20   : > { %1141 = vmatprep.subr.bf16.mxu1 %v1337_v1  ;;  %v1037_v26 = vld [vmem:[%s1666_s2] ss:$0 sm:$0xff] }
  0x21   : > { %1122 = vmatpush3.bf16.msra.mxu0 %v1241_v3  ;;  %v1046_v34 = vld [vmem:[%s1668_s4] ss:$0 sm:$0xff] }
  0x22   : > { %1123 = vmatprep.subr.bf16.mxu0 %v1337_v1  ;;  %v1055_v47 = vld [vmem:[%s1670_s6] ss:$0 sm:$0xff] }
  0x23   : > { %1142 = vmatpush3.bf16.msra.mxu1 %v1249_v8 }
  0x24   : > { %1143 = vmatprep.subr.bf16.mxu1 %v1337_v1 }
  0x25   : > { %1124 = vmatpush3.bf16.msra.mxu0 %v1242_v5 }
  0x26   : > { %1125 = vmatprep.subr.bf16.mxu0 %v1337_v1 }
  0x27   : > { %1144 = vmatpush3.bf16.msra.mxu1 %v1250_v10 }
  0x28   : > { %1145 = vmatprep.subr.bf16.mxu1 %v1337_v1 }
  0x29   : > { %1126 = vmatpush3.bf16.msra.mxu0 %v1243_v7 }
  0x2a   : > { %1127 = vmatprep.subr.bf16.mxu0 %v1337_v1 }
  0x2b   : > { %1146 = vmatpush3.bf16.msra.mxu1 %v1251_v12 }
  0x2c   : > { %1147 = vmatprep.subr.bf16.mxu1 %v1337_v1 }
  0x2d   : > { %1128 = vmatpush3.bf16.msra.mxu0 %v1244_v9 }
  0x2e   : > { %1129 = vmatprep.subr.bf16.mxu0 %v1337_v1 }
  0x2f   : > { %1148 = vmatpush3.bf16.msra.mxu1 %v1252_v14 }
  0x30   : > { %1149 = vmatprep.subr.bf16.mxu1 %v1337_v1 }
  0x31   : > { %1130 = vmatpush3.bf16.msra.mxu0 %v1245_v11 }
  0x32   : > { %1131 = vmatprep.subr.bf16.mxu0 %v1337_v1 }
  0x33   : > { %1150 = vmatpush3.bf16.msra.mxu1 %v1253_v16 }
  0x34   : > { %1151 = vmatprep.subr.bf16.mxu1 %v1337_v1 }
  0x35   : > { %1132 = vmatpush3.bf16.msra.mxu0 %v1246_v13 }
  0x36   : > { %1157 = vmatprep.subr.bf16.mxu0 %v1337_v1 }
  0x37   : > { %1152 = vmatpush3.bf16.msra.mxu1 %v1254_v17 }
  0x38   : > { %1134 = vmatmul.mubr.bf16.vlgmr.msra.gmra.mxu0 %v408_v15 }
  0x39   : > { %1173 = vmatprep.mubr.msk.bf16.mxu0 %vm1338_vm0, %v1337_v1  ;;  %1158 = vmatpush3.bf16.msra.mxu0 %v1255_v18 }
  0x3a   : > { %1159 = vmatprep.subr.bf16.mxu0 %v1337_v1 }
  0x3d   : > { %1160 = vmatpush3.bf16.msra.mxu0 %v1256_v19 }
  0x3e   : > { %1161 = vmatprep.subr.bf16.mxu0 %v1337_v1 }
  0x41   : > { %1162 = vmatpush3.bf16.msra.mxu0 %v1257_v20 }
  0x42   : > { %1163 = vmatprep.subr.bf16.mxu0 %v1337_v1 }
  0x45   : > { %1164 = vmatpush3.bf16.msra.mxu0 %v1258_v21 }
  0x46   : > { %1165 = vmatprep.subr.bf16.mxu0 %v1337_v1 }
  0x49   : > { %1166 = vmatpush3.bf16.msra.mxu0 %v1259_v22 }
  0x4a   : > { %1167 = vmatprep.subr.bf16.mxu0 %v1337_v1 }
  0x4d   : > { %1168 = vmatpush3.bf16.msra.mxu0 %v1260_v23 }
  0x4e   : > { %1169 = vmatprep.subr.bf16.mxu0 %v1337_v1 }
  0x51   : > { %1170 = vmatpush3.bf16.msra.mxu0 %v1261_v24 }
  0x52   : > { %1171 = vmatprep.subr.bf16.mxu0 %v1337_v1 }
  0x55   : > { %1172 = vmatpush3.bf16.msra.mxu0 %v1262_v25 }
  0x58   : > { %1174 = vmatmul.mubr.bf16.vlgmr.msra.gmra.mxu0 %v408_v15 }
  0xf8   : > { %v514_v27 = vpop.f32.mrf.mxu0 }
  0xf9   : > { %v515_v28 = vadd.f32 %v1037_v26, %v514_v27 }
  0xfa   : > { %v1135_v29 = vpop.f32.mrf.mxu0 }
  0xfb   : > { %v520_v30 = vmax.f32 %v515_v28, 0.0 }
  0xfc   : > { %v517_v31 = vpop.f32.mrf.mxu0 }
  0xfd   : > { %v521_v32 = vpack.c.bf16 %v520_v30, %v520_v30 }
  0xfe   : > { %v1136_v33 = vpop.f32.mrf.mxu0 }
  0xff   : > { %1154 = vmatmul.mubr.bf16.vlgmr.msra.gmra.mxu1 %v521_v32 }
 0x118   : > { %v745_v41 = vpop.f32.mrf.mxu0 }
 0x119   : > { %v746_v50 = vadd.f32 %v1055_v47, %v745_v41 }
 0x11a   : > { %v1175_v43 = vpop.f32.mrf.mxu0 }
 0x11b   : > { %753 = vst [vmem:[%s752_s29] sm:$0xff] %v746_v50  ;;  %v761_v51 = vsel %vm758_vm1, %v746_v50, 0.0 }
 0x11c   : > { %v748_v45 = vpop.f32.mrf.mxu0 }
 0x11e   : > { %v1176_v49 = vpop.f32.mrf.mxu0 }
 0x1bf   : > { %v627_v35 = vpop.f32.mrf.mxu1 }
 0x1c0   : > { %v628_v36 = vadd.f32 %v1046_v34, %v627_v35 }
 0x1c1   : > { %v1155_v37 = vpop.f32.mrf.mxu1 }
 0x1c2   : > { %v633_v38 = vmul.f32 %v628_v36, %v628_v36 }
 0x1c3   : > { %v630_v39 = vpop.f32.mrf.mxu1 }
 0x1c4   : > { %634 = vadd.xlane.f32.xlu0 %v633_v38 }
 0x1c5   : > { %v1156_v40 = vpop.f32.mrf.mxu1 }
 0x24d   : > { %v635_v52 = vpop.xlane.xlu0 %634 }
 0x24e   : > { %v636_v53 = vmax.f32 %v635_v52, 1e-24 }
 0x250   : > { %1263 = vrsqrt.f32 %v636_v53 }
 0x25c   : > { %765 = sbr.rel (%p1065_p11) target bundleno = 611 (0x263), region = 68 }
 0x25d   : > { %v1264_v54 = vpop.eup %1263 }
 0x25e   : > { %v638_v55 = vmul.f32 %v1264_v54, %v628_v36 }
 0x260   : > { %639 = vst [vmem:[%s402_s17] sm:$0xff] %v638_v55 }
 0x261   : > { %v1339_v56 = vmov 0.0  }
 0x262   : > { %766 = vst [vmem:[#allocation3] sm:$0x1] %v1339_v56  ;;  %767 = vst [vmem:[#allocation4] sm:$0x1] %v1339_v56 }
 0x263 PF: > { %v769_v57 = vrot.slane %v761_v51, 4  ;;  %v778_v58 = vmul.f32 %v761_v51, %v761_v51  ;;  %p1066_p12 = scmp.ne.s32.totalorder %s1427_s25, 2 }
 0x265   : > { %v770_v59 = vadd.f32 %v769_v57, %v761_v51  ;;  %v779_v60 = vrot.slane %v778_v58, 4 }
 0x267   : > { %v771_v61 = vrot.slane %v770_v59, 2  ;;  %v780_v62 = vadd.f32 %v779_v60, %v778_v58 }
 0x269   : > { %v772_v63 = vadd.f32 %v771_v61, %v770_v59  ;;  %v781_v0 = vrot.slane %v780_v62, 2  ;;  %v768_v3 = vld [vmem:[#allocation3] sm:$0x1]  ;;  %v777_v6 = vld [vmem:[#allocation4] sm:$0x1] }
 0x26b   : > { %v773_v1 = vrot.slane %v772_v63, 1  ;;  %v782_v2 = vadd.f32 %v781_v0, %v780_v62 }
 0x26d   : > { %v774_v4 = vadd.f32 %v773_v1, %v772_v63  ;;  %v783_v5 = vrot.slane %v782_v2, 1 }
 0x26f   : > { %v775_v7 = vadd.f32 %v774_v4, %v768_v3  ;;  %v784_v8 = vadd.f32 %v783_v5, %v782_v2  ;;  %790 = sbr.rel (%p1066_p12) target bundleno = 872 (0x368), region = 72 }
 0x271   : > { %776 = vst [vmem:[#allocation3] sm:$0x1] %v775_v7  ;;  %v785_v9 = vadd.f32 %v784_v8, %v777_v6 }
 0x273   : > { %786 = vst [vmem:[#allocation4] sm:$0x1] %v785_v9 }
 0x274   : > { %v1265_v10 = vld [vmem:[%s1673_s9 + $0x38] sm:$0xff]   ;;  %v1266_v11 = vld [vmem:[%s1673_s9 + $0x30] sm:$0xff]   ;;  %v1267_v12 = vld [vmem:[%s1673_s9 + $0x28] sm:$0xff]   ;;  %v811_v27 = vsub.s32 0, %v1568_v44 }
 0x275   : > { %1177 = vmatprep.subr.bf16.mxu0 %v1265_v10  ;;  %v1268_v13 = vld [vmem:[%s1673_s9 + $0x20] sm:$0xff]   ;;  %v1269_v19 = vld [vmem:[%s1673_s9 + $0x18] sm:$0xff]   ;;  %v1270_v22 = vld [vmem:[%s1673_s9 + $0x10] sm:$0xff]  }
 0x276   : > { %1178 = vmatpush3.bf16.msra.mxu0 %v1265_v10  ;;  %v1271_v24 = vld [vmem:[%s1673_s9 + $0x8] sm:$0xff]   ;;  %v1272_v25 = vld [vmem:[%s1673_s9] sm:$0xff]   ;;  %v807_v33 = vld [vmem:[#allocation2 + $0x10] sm:$0xff] }
 0x277   : > { %1179 = vmatprep.subr.bf16.mxu0 %v1266_v11  ;;  %v798_v26 = vld [vmem:[%s1671_s7] sm:$0x1]  ;;  %v806_v32 = vld [vmem:[#allocation2 + $0x8] sm:$0xff] }
 0x278   : > { %v791_v14 = vld [vmem:[#allocation3] sm:$0x1]  ;;  %v802_v30 = vld [vmem:[%s1672_s8] sm:$0x1] }
 0x279   : > { %v792_v16 = vmul.f32 0.05, %v791_v14  ;;  %v805_v31 = vld [vmem:[#allocation2] sm:$0xff] }
 0x27a   : > { %1180 = vmatpush3.bf16.msra.mxu0 %v1266_v11  ;;  %v793_v15 = vld [vmem:[#allocation4] sm:$0x1]  ;;  %v1067_v46 = vld [vmem:[%s1674_s10] ss:$0 sm:$0xff] }
 0x27b   : > { %1181 = vmatprep.subr.bf16.mxu0 %v1267_v12  ;;  %v794_v17 = vmul.f32 0.05, %v793_v15  ;;  %v795_v18 = vmul.f32 %v792_v16, %v792_v16 }
 0x27d   : > { %v796_v20 = vsub.f32 %v794_v17, %v795_v18 }
 0x27e   : > { %1182 = vmatpush3.bf16.msra.mxu0 %v1267_v12 }
 0x27f   : > { %1183 = vmatprep.subr.bf16.mxu0 %v1268_v13  ;;  %v797_v21 = vmax.f32 %v796_v20, 0.0 }
 0x281   : > { %v799_v23 = vadd.f32 1e-05, %v797_v21 }
 0x282   : > { %1184 = vmatpush3.bf16.msra.mxu0 %v1268_v13 }
 0x283   : > { %1185 = vmatprep.subr.bf16.mxu0 %v1269_v19  ;;  %1273 = vrsqrt.f32 %v799_v23 }
 0x286   : > { %1186 = vmatpush3.bf16.msra.mxu0 %v1269_v19 }
 0x287   : > { %1187 = vmatprep.subr.bf16.mxu0 %v1270_v22 }
 0x28a   : > { %1188 = vmatpush3.bf16.msra.mxu0 %v1270_v22 }
 0x28b   : > { %1189 = vmatprep.subr.bf16.mxu0 %v1271_v24 }
 0x28e   : > { %1190 = vmatpush3.bf16.msra.mxu0 %v1271_v24 }
 0x28f   : > { %1191 = vmatprep.subr.bf16.mxu0 %v1272_v25 }
 0x290   : > { %v1274_v28 = vpop.eup %1273 }
 0x291   : > { %v801_v29 = vmul.f32 %v1274_v28, %v798_v26 }
 0x292   : > { %1192 = vmatpush3.bf16.msra.mxu0 %v1272_v25 }
 0x293   : > { %v803_v34 = vmul.f32 %v801_v29, %v792_v16  ;;  %v812_v35 = vrot.slane %v801_v29, %v811_v27 }
 0x295   : > { %v804_v36 = vsub.f32 %v802_v30, %v803_v34  ;;  %v814_v37 = vmul.f32 %v812_v35, %v805_v31  ;;  %v815_v38 = vmul.f32 %v812_v35, %v806_v32  ;;  %v816_v39 = vmul.f32 %v812_v35, %v807_v33 }
 0x297   : > { %v821_v40 = vrot.slane %v804_v36, %v811_v27 }
 0x299   : > { %v823_v41 = vadd.f32 %v821_v40, %v814_v37  ;;  %v824_v42 = vadd.f32 %v821_v40, %v815_v38  ;;  %v825_v43 = vadd.f32 %v821_v40, %v816_v39 }
 0x29b   : > { %v826_v44 = vpack.c.bf16 %v824_v42, %v823_v41  ;;  %v827_v45 = vpack.c.bf16 %v825_v43, %v825_v43 }
 0x29d   : > { %1193 = vmatprep.mubr.bf16.mxu0 %v826_v44 }
 0x29e   : > { %1194 = vmatmul.mubr.bf16.vlgmr.msra.gmra.mxu0 %v827_v45 }
 0x35e   : > { %v1195_v47 = vpop.f32.mrf.mxu0 }
 0x35f   : > { %v942_v48 = vadd.f32 %v1195_v47, %v1067_v46 }
 0x360   : > { %v933_v49 = vpop.f32.mrf.mxu0 }
 0x361   : > { %949 = vst [vmem:[%s1675_s11 + $0x10] sm:$0xff] %v942_v48  ;;  %v934_v50 = vadd.f32 %v1067_v46, %v933_v49 }
 0x362   : > { %v1196_v51 = vpop.f32.mrf.mxu0 }
 0x363   : > { %947 = vst [vmem:[%s1675_s11] sm:$0xff] %v934_v50 }
 0x364   : > { %v936_v52 = vpop.f32.mrf.mxu0 }
 0x365   : > { %v937_v53 = vadd.f32 %v1067_v46, %v936_v52 }
 0x367   : > { %948 = vst [vmem:[%s1675_s11 + $0x8] sm:$0xff] %v937_v53 }
 0x368 PF: > { %s1077_s23 = sshll.u32 %s1427_s25, 7  ;;  %s967_s15 = sshll.u32 %s402_s17, 4  ;;  %s968_s15 = int_to_ptr.vmem [resolvable:$true] %s967_s15 }
 0x369   : > { %s965_s29 = scalar_lea.hbm %s1676_s12, %s1077_s23  ;;  %s1687_s18 = sand.u32 1, %s1327_s22  }
 0x36a   : > { %s951_s19 = scalar_lea.sflag [#allocation6], %s1687_s18  ;;  %s1275_s0 = scalar_lea.vmem %s968_s15, 128 }
 0x36b   : > { %p1276_p13 = scmp.ne.s32.totalorder %s968_s15, %s1275_s0  ;;  %s1340_s20 = smov [#allocation5]  }
 0x36c   : > { %s1279_s26 = sshll.u32 %s1340_s20, 4  ;;  %s1280_s26 = int_to_ptr.vmem [resolvable:$false] %s1279_s26 }
 0x36d   : > { %p1277_p0 = pnand %p1276_p13, %p1444_p5  ;;  %s1281_s1 = scalar_lea.vmem %s1280_s26, 256 }
 0x36e   : > { %p1282_p2 = scmp.lt.s32.totalorder %s968_s15, %s1280_s26  ;;  %p1283_p3 = scmp.lt.s32.totalorder %s1281_s1, %s1275_s0 }
 0x36f   : > { %p1278_p1 = pneg %p1277_p0 }
 0x370   : > { %p1284_p4 = por %p1283_p3, %p1282_p2 }
 0x372   : > { %p1285_p7 = pnand %p1284_p4, %p1278_p1 }
 0x374   : > { %1288 = shalt.err (!%p1285_p7)
}
 0x375   : > { %s1289_s25 = scalar_lea.hbm %s965_s29, 128  ;;  %s1293_s23 = scalar_lea.hbm %s1676_s12, 384 }
 0x376   : > { %p1290_p8 = scmp.ne.s32.totalorder %s965_s29, %s1289_s25  ;;  %p1294_p11 = scmp.lt.s32.totalorder %s965_s29, %s1676_s12 }
 0x377   : > { %p1295_p12 = scmp.lt.s32.totalorder %s1293_s23, %s1289_s25 }
 0x378   : > { %p1291_p9 = pnand %p1290_p8, %p1444_p5 }
 0x379   : > { %p1296_p13 = por %p1295_p12, %p1294_p11 }
 0x37a   : > { %p1292_p10 = pneg %p1291_p9 }
 0x37c   : > { %p1297_p0 = pnand %p1296_p13, %p1292_p10 }
 0x37e   : > { %1300 = shalt.err (!%p1297_p0)
}
 0x37f   : > { %1197 = dma.vmem_to_hbm [thread:$0]  (%p1444_p5), %s968_s15, 128, %s965_s29, %s951_s19  }
 0x380 PF: > { %p1203_p1 = scmp.ge.s32.totalorder %s1335_s24, 2  ;;  %s982_s0 = sand.u32 1, %s1323_s21  }
 0x381   : > { %s983_s1 = scalar_lea.sflag [#allocation6], %s982_s0 }
 0x382   : > { %p1200_p2 = pnand %p1203_p1, %p1448_p6 }
 0x384   : > { %p1201_p3 = pneg %p1200_p2 }
 0x386   : > { %1318 = dma.done.wait (%p1201_p3), %s983_s1, 128  }
 0x387   : > { %1320 = vsyncadd (%p1201_p3), %s983_s1, 4294967168  ;;  %s1688_s18 = sld [smem:[#allocation8_spill]]  ;;  %p23_p4 = scmp.ge.s32.totalorder %s1431_s27, 5  }
 0x388   : > { %s1689_s23 = sld [smem:[#allocation9_spill]]  ;;  %s1690_s21 = smov %s1327_s22 }
 0x389   : > { %s1692_s24 = smov %s1431_s27  ;;  %25 = sbr.rel (!%p23_p4) target bundleno = 6 (0x6), region = 116 }
 0x38d   : > { %s1691_s22 = smov %s1688_s18 }
 0x38e   :  { %988 = vsyncpa [#allocation6], 1 }
 0x38f   :  { %990 = vsyncpa [#allocation6 + $0x1], 1 }

</bundles_post_ra>
